<compile_context>
chip_gen: v7x
topology: tpu7x:2x2x1
jax: 0.10.0
libtpu: 0.0.40
codegen_flags: <defaults>
</compile_context>

<pallas_src>
import jax
import jax.numpy as jnp
from jax.experimental import pallas as pl
from jax.experimental.pallas import tpu as pltpu


def _avg_matrix(out_dim, k):
    """(out_dim, out_dim*k) block-averaging matrix with entries 1/k (exact f32)."""
    return jnp.kron(jnp.eye(out_dim, dtype=jnp.float32),
                    jnp.ones((1, k), jnp.float32)) / jnp.float32(k)


def _make_kernel(scales, factors, n_mats, block_b):
    """Build the fused multi-scale loss kernel for a static configuration.

    Kernel refs (positional):
      tgt_ref                      (B, H, W)      full-res target block
      inp_ref[s], s=0..scales-1    (B, Hp_s, Wp_s) per-scale predictions
      mat_ref[m], m=0..n_mats-1    row / col averaging matrices (only for
                                   pooling steps with factor > 1)
      out_ref[2s], out_ref[2s+1]   (1, 8, 128)    per-block loss-sum / count
    """

    def kernel(*refs):
        tgt_ref = refs[0]
        inp_refs = refs[1:1 + scales]
        mat_refs = refs[1 + scales:1 + scales + n_mats]
        out_refs = refs[1 + scales + n_mats:]

        # Hoist the (small, constant) pooling matrices out of the plane loop.
        mats = [m[...] for m in mat_refs]

        loss_acc = [jnp.float32(0.0) for _ in range(scales)]
        cnt_acc = [jnp.float32(0.0) for _ in range(scales)]

        for b in range(block_b):                    # static unroll over planes
            cur = tgt_ref[b]                        # (H, W) f32
            mi = 0
            for s in range(scales):
                f = factors[s]
                if f > 1:
                    # AvgPool2d(f, f) == P_h @ cur @ P_w^T  (exact average).
                    ph = mats[mi]                   # (h//f, h)
                    pwt = mats[mi + 1]              # (w, w//f)
                    mi += 2
                    cur = jnp.dot(
                        jnp.dot(ph, cur, preferred_element_type=jnp.float32),
                        pwt,
                        preferred_element_type=jnp.float32,
                    )
                # else: identity pooling -> reuse cur directly (no matmul).

                x = inp_refs[s][b]                  # (Hp_s, Wp_s)
                valid = cur < 192.0                 # EPE's target_valid mask
                d = x - cur
                ad = jnp.abs(d)
                sl1 = jnp.where(ad < 1.0, 0.5 * d * d, ad - 0.5)  # SmoothL1, beta=1

                loss_acc[s] = loss_acc[s] + jnp.sum(jnp.where(valid, sl1, 0.0))
                cnt_acc[s] = cnt_acc[s] + jnp.sum(valid.astype(jnp.float32))

        # Lane-dense, unmasked stores of the per-block partials.
        for s in range(scales):
            out_refs[2 * s][...] = jnp.broadcast_to(
                loss_acc[s], (1, 8, 128)).astype(jnp.float32)
            out_refs[2 * s + 1][...] = jnp.broadcast_to(
                cnt_acc[s], (1, 8, 128)).astype(jnp.float32)

    return kernel


def multi_scale_loss(inputs, target, *, downscale=1, weights=None):
    """Forward pass of MultiScaleLoss (tuple input path, mask=False)."""
    scales = len(inputs)
    if weights is None:
        weights = jnp.ones((scales,), jnp.float32)   # torch.Tensor(scales).fill_(1)
    else:
        weights = jnp.asarray(weights, jnp.float32)
    assert weights.shape[0] == scales

    N, C, H, W = target.shape
    NC = N * C

    # Hierarchical pooling factors: scale 0 pools by `downscale`, every
    # subsequent scale pools the previous one by 2 (k_i = downscale * 2**i).
    factors = [downscale] + [2] * (scales - 1)

    # Per-scale shapes + divisibility checks (AvgPool2d remainder-drop not
    # supported here).
    scale_hw = []
    k = 1
    for s in range(scales):
        k *= factors[s]
        assert H % k == 0 and W % k == 0, (H, W, k)
        Hp, Wp = H // k, W // k
        assert inputs[s].shape == (N, C, Hp, Wp), (inputs[s].shape, (N, C, Hp, Wp))
        scale_hw.append((Hp, Wp))

    tgt = target.reshape(NC, H, W).astype(jnp.float32)
    inps = [inputs[s].reshape(NC, scale_hw[s][0], scale_hw[s][1]).astype(jnp.float32)
            for s in range(scales)]

    # Averaging matrices only for pooling steps with factor > 1 (identity is
    # skipped in-kernel).
    mats = []
    h, w = H, W
    for s in range(scales):
        f = factors[s]
        if f > 1:
            hn, wn = h // f, w // f
            mats.append(_avg_matrix(hn, f))        # (hn, h)   row pooling
            mats.append(_avg_matrix(wn, f).T)      # (w, wn)   col pooling (transposed)
            h, w = hn, wn
    n_mats = len(mats)

    # Planes per grid step: largest divisor of NC with <= ~2 MiB target block
    # (keeps double-buffered blocks inside v5e's 16 MiB scoped VMEM default
    # and well under v7x's 64 MiB physical VMEM).
    max_block_bytes = 2 * 1024 * 1024
    B = 1
    for cand in range(1, min(NC, 8) + 1):
        if NC % cand == 0 and cand * H * W * 4 <= max_block_bytes:
            B = cand
    G = NC // B

    in_specs = [pl.BlockSpec((B, H, W), lambda i: (i, 0, 0))]
    for s in range(scales):
        Hp, Wp = scale_hw[s]
        in_specs.append(pl.BlockSpec((B, Hp, Wp), lambda i: (i, 0, 0)))
    for m in mats:
        in_specs.append(pl.BlockSpec(m.shape, lambda i: (0, 0)))

    out_specs = tuple(pl.BlockSpec((1, 8, 128), lambda i: (i, 0, 0))
                      for _ in range(2 * scales))
    out_shape = tuple(jax.ShapeDtypeStruct((G, 8, 128), jnp.float32)
                      for _ in range(2 * scales))

    kernel = _make_kernel(scales, factors, n_mats, B)

    outs = pl.pallas_call(
        kernel,
        out_shape=out_shape,
        grid_spec=pltpu.PrefetchScalarGridSpec(
            num_scalar_prefetch=0,
            grid=(G,),
            in_specs=in_specs,
            out_specs=out_specs,
        ),
        compiler_params=pltpu.CompilerParams(
            dimension_semantics=("parallel",)),
    )(tgt, *inps, *mats)

    # Tiny cross-block reduction + per-scale masked mean + weighted sum in JAX.
    # NOTE: if a scale has zero valid elements the divide yields NaN, matching
    # PyTorch's mean over an empty selection.
    out = jnp.float32(0.0)
    for s in range(scales):
        loss_sum = jnp.sum(outs[2 * s][:, 0, 0])
        cnt_sum = jnp.sum(outs[2 * s + 1][:, 0, 0])
        out = out + weights[s] * (loss_sum / cnt_sum)
    return out


def _reference_loss(inputs, target, *, downscale=1, weights=None):
    """Pure-JAX reference mirroring the PyTorch forward (direct pooling)."""
    scales = len(inputs)
    w = jnp.ones((scales,), jnp.float32) if weights is None else jnp.asarray(
        weights, jnp.float32)
    N, C, H, W = target.shape
    out = jnp.float32(0.0)
    for i, x in enumerate(inputs):
        k = downscale * (2 ** i)
        t = target.reshape(N, C, H // k, k, W // k, k).mean(axis=(3, 5))
        valid = t < 192.0
        d = x - t
        ad = jnp.abs(d)
        sl1 = jnp.where(ad < 1.0, 0.5 * d * d, ad - 0.5)
        out = out + w[i] * (jnp.sum(jnp.where(valid, sl1, 0.0))
                            / jnp.sum(valid.astype(jnp.float32)))
    return out


if __name__ == "__main__":
    key = jax.random.PRNGKey(0)
    N, C, H, W = 2, 1, 16, 16
    k_t, k0, k1, k2, k3, k4 = jax.random.split(key, 6)

    # Disparity-like target in [0, 256): most pooled values < 192 (valid).
    target = jax.random.uniform(k_t, (N, C, H, W), jnp.float32, 0.0, 256.0)

    # Config A: downscale=1, 3 scales (exercises identity-skip + hierarchical
    # by-2 pooling).
    inputs_a = (
        jax.random.uniform(k0, (N, C, H, W), jnp.float32, 0.0, 200.0),
        jax.random.uniform(k1, (N, C, H // 2, W // 2), jnp.float32, 0.0, 200.0),
        jax.random.uniform(k2, (N, C, H // 4, W // 4), jnp.float32, 0.0, 200.0),
    )
    out_a = jax.block_until_ready(multi_scale_loss(inputs_a, target, downscale=1))
    ref_a = _reference_loss(inputs_a, target, downscale=1)
    assert jnp.allclose(out_a, ref_a, rtol=1e-4, atol=1e-4), (out_a, ref_a)

    # Config B: downscale=2, 2 scales, non-trivial weights (exercises the
    # matmul pooling path at scale 0).
    inputs_b = (
        jax.random.uniform(k3, (N, C, H // 2, W // 2), jnp.float32, 0.0, 200.0),
        jax.random.uniform(k4, (N, C, H // 4, W // 4), jnp.float32, 0.0, 200.0),
    )
    wts = [0.5, 1.0]
    out_b = jax.block_until_ready(
        multi_scale_loss(inputs_b, target, downscale=2, weights=wts))
    ref_b = _reference_loss(inputs_b, target, downscale=2, weights=wts)
    assert jnp.allclose(out_b, ref_b, rtol=1e-4, atol=1e-4), (out_b, ref_b)

    print("KERNEL_OK")
</pallas_src>

<mosaic_0001>
module attributes {stable_mosaic.version = 11 : i64} {
  func.func @kernel(%arg0: i32, %arg1: memref<2x16x16xf32, #tpu.memory_space<vmem>>, %arg2: memref<2x16x16xf32, #tpu.memory_space<vmem>>, %arg3: memref<2x8x8xf32, #tpu.memory_space<vmem>>, %arg4: memref<2x4x4xf32, #tpu.memory_space<vmem>>, %arg5: memref<8x16xf32, #tpu.memory_space<vmem>>, %arg6: memref<16x8xf32, #tpu.memory_space<vmem>>, %arg7: memref<4x8xf32, #tpu.memory_space<vmem>>, %arg8: memref<8x4xf32, #tpu.memory_space<vmem>>, %arg9: memref<1x8x128xf32, #tpu.memory_space<vmem>>, %arg10: memref<1x8x128xf32, #tpu.memory_space<vmem>>, %arg11: memref<1x8x128xf32, #tpu.memory_space<vmem>>, %arg12: memref<1x8x128xf32, #tpu.memory_space<vmem>>, %arg13: memref<1x8x128xf32, #tpu.memory_space<vmem>>, %arg14: memref<1x8x128xf32, #tpu.memory_space<vmem>>) attributes {dimension_semantics = [#tpu.dimension_semantics<parallel>], iteration_bounds = array<i64: 1>, scalar_prefetch = 0 : i64, scratch_operands = 0 : i64, tpu.core_type = #tpu.core_type<tc>, window_params = [{transform_indices = @transform_0, window_bounds = array<i64: 2, 16, 16>}, {transform_indices = @transform_1, window_bounds = array<i64: 2, 16, 16>}, {transform_indices = @transform_2, window_bounds = array<i64: 2, 8, 8>}, {transform_indices = @transform_3, window_bounds = array<i64: 2, 4, 4>}, {pipeline_mode = #tpu.pipeline_mode<synchronous>, transform_indices = @transform_4, window_bounds = array<i64: 8, 16>}, {pipeline_mode = #tpu.pipeline_mode<synchronous>, transform_indices = @transform_5, window_bounds = array<i64: 16, 8>}, {pipeline_mode = #tpu.pipeline_mode<synchronous>, transform_indices = @transform_6, window_bounds = array<i64: 4, 8>}, {pipeline_mode = #tpu.pipeline_mode<synchronous>, transform_indices = @transform_7, window_bounds = array<i64: 8, 4>}, {transform_indices = @transform_8, window_bounds = array<i64: 1, 8, 128>}, {transform_indices = @transform_9, window_bounds = array<i64: 1, 8, 128>}, {transform_indices = @transform_10, window_bounds = array<i64: 1, 8, 128>}, {transform_indices = @transform_11, window_bounds = array<i64: 1, 8, 128>}, {transform_indices = @transform_12, window_bounds = array<i64: 1, 8, 128>}, {transform_indices = @transform_13, window_bounds = array<i64: 1, 8, 128>}]} {
    %c0 = arith.constant 0 : index
    %c0_0 = arith.constant 0 : index
    %0 = vector.load %arg5[%c0, %c0_0] : memref<8x16xf32, #tpu.memory_space<vmem>>, vector<8x16xf32>
    %c0_1 = arith.constant 0 : index
    %c0_2 = arith.constant 0 : index
    %1 = vector.load %arg6[%c0_1, %c0_2] : memref<16x8xf32, #tpu.memory_space<vmem>>, vector<16x8xf32>
    %c0_3 = arith.constant 0 : index
    %c0_4 = arith.constant 0 : index
    %2 = vector.load %arg7[%c0_3, %c0_4] : memref<4x8xf32, #tpu.memory_space<vmem>>, vector<4x8xf32>
    %c0_5 = arith.constant 0 : index
    %c0_6 = arith.constant 0 : index
    %3 = vector.load %arg8[%c0_5, %c0_6] : memref<8x4xf32, #tpu.memory_space<vmem>>, vector<8x4xf32>
    %c0_7 = arith.constant 0 : index
    %c0_8 = arith.constant 0 : index
    %c0_9 = arith.constant 0 : index
    %4 = vector.load %arg1[%c0_7, %c0_8, %c0_9] : memref<2x16x16xf32, #tpu.memory_space<vmem>>, vector<1x16x16xf32>
    %5 = vector.shape_cast %4 : vector<1x16x16xf32> to vector<16x16xf32>
    %c0_10 = arith.constant 0 : index
    %c0_11 = arith.constant 0 : index
    %c0_12 = arith.constant 0 : index
    %6 = vector.load %arg2[%c0_10, %c0_11, %c0_12] : memref<2x16x16xf32, #tpu.memory_space<vmem>>, vector<1x16x16xf32>
    %7 = vector.shape_cast %6 : vector<1x16x16xf32> to vector<16x16xf32>
    %cst = arith.constant 1.920000e+02 : f32
    %8 = vector.broadcast %cst : f32 to vector<16x16xf32>
    %9 = arith.cmpf olt, %5, %8 : vector<16x16xf32>
    %10 = arith.subf %7, %5 : vector<16x16xf32>
    %11 = math.absf %10 : vector<16x16xf32>
    %cst_13 = arith.constant 1.000000e+00 : f32
    %12 = vector.broadcast %cst_13 : f32 to vector<16x16xf32>
    %13 = arith.cmpf olt, %11, %12 : vector<16x16xf32>
    %cst_14 = arith.constant 5.000000e-01 : f32
    %14 = vector.broadcast %cst_14 : f32 to vector<16x16xf32>
    %15 = arith.mulf %14, %10 : vector<16x16xf32>
    %16 = arith.mulf %15, %10 : vector<16x16xf32>
    %cst_15 = arith.constant 5.000000e-01 : f32
    %17 = vector.broadcast %cst_15 : f32 to vector<16x16xf32>
    %18 = arith.subf %11, %17 : vector<16x16xf32>
    %19 = arith.select %13, %16, %18 : vector<16x16xi1>, vector<16x16xf32>
    %cst_16 = arith.constant 0.000000e+00 : f32
    %20 = vector.broadcast %cst_16 : f32 to vector<16x16xf32>
    %21 = arith.select %9, %19, %20 : vector<16x16xi1>, vector<16x16xf32>
    %22 = vector.shape_cast %21 : vector<16x16xf32> to vector<1x16x16xf32>
    %cst_17 = arith.constant dense<0.000000e+00> : vector<1xf32>
    %23 = vector.multi_reduction <add>, %22, %cst_17 [1, 2] : vector<1x16x16xf32> to vector<1xf32>
    %24 = vector.shape_cast %23 : vector<1xf32> to vector<1x1x1xf32>
    %25 = vector.extract %24[0, 0, 0] : f32 from vector<1x1x1xf32>
    %cst_18 = arith.constant 0.000000e+00 : f32
    %26 = arith.addf %cst_18, %25 : f32
    %27 = arith.extui %9 : vector<16x16xi1> to vector<16x16xi32>
    %28 = arith.sitofp %27 : vector<16x16xi32> to vector<16x16xf32>
    %29 = vector.shape_cast %28 : vector<16x16xf32> to vector<1x16x16xf32>
    %cst_19 = arith.constant dense<0.000000e+00> : vector<1xf32>
    %30 = vector.multi_reduction <add>, %29, %cst_19 [1, 2] : vector<1x16x16xf32> to vector<1xf32>
    %31 = vector.shape_cast %30 : vector<1xf32> to vector<1x1x1xf32>
    %32 = vector.extract %31[0, 0, 0] : f32 from vector<1x1x1xf32>
    %cst_20 = arith.constant 0.000000e+00 : f32
    %33 = arith.addf %cst_20, %32 : f32
    %cst_21 = arith.constant dense<0.000000e+00> : vector<8x16xf32>
    %34 = tpu.matmul %0, %5, %cst_21 {dimension_numbers = #tpu.dot_dimension_numbers<[1], [0], [0], [1], [0, 0, 1, 1], [], []>} : vector<8x16xf32>, vector<16x16xf32>, vector<8x16xf32> -> vector<8x16xf32>
    %cst_22 = arith.constant dense<0.000000e+00> : vector<8x8xf32>
    %35 = tpu.matmul %34, %1, %cst_22 {dimension_numbers = #tpu.dot_dimension_numbers<[1], [0], [0], [1], [0, 0, 1, 1], [], []>} : vector<8x16xf32>, vector<16x8xf32>, vector<8x8xf32> -> vector<8x8xf32>
    %c0_23 = arith.constant 0 : index
    %c0_24 = arith.constant 0 : index
    %c0_25 = arith.constant 0 : index
    %36 = vector.load %arg3[%c0_23, %c0_24, %c0_25] : memref<2x8x8xf32, #tpu.memory_space<vmem>>, vector<1x8x8xf32>
    %37 = vector.shape_cast %36 : vector<1x8x8xf32> to vector<8x8xf32>
    %cst_26 = arith.constant 1.920000e+02 : f32
    %38 = vector.broadcast %cst_26 : f32 to vector<8x8xf32>
    %39 = arith.cmpf olt, %35, %38 : vector<8x8xf32>
    %40 = arith.subf %37, %35 : vector<8x8xf32>
    %41 = math.absf %40 : vector<8x8xf32>
    %cst_27 = arith.constant 1.000000e+00 : f32
    %42 = vector.broadcast %cst_27 : f32 to vector<8x8xf32>
    %43 = arith.cmpf olt, %41, %42 : vector<8x8xf32>
    %cst_28 = arith.constant 5.000000e-01 : f32
    %44 = vector.broadcast %cst_28 : f32 to vector<8x8xf32>
    %45 = arith.mulf %44, %40 : vector<8x8xf32>
    %46 = arith.mulf %45, %40 : vector<8x8xf32>
    %cst_29 = arith.constant 5.000000e-01 : f32
    %47 = vector.broadcast %cst_29 : f32 to vector<8x8xf32>
    %48 = arith.subf %41, %47 : vector<8x8xf32>
    %49 = arith.select %43, %46, %48 : vector<8x8xi1>, vector<8x8xf32>
    %cst_30 = arith.constant 0.000000e+00 : f32
    %50 = vector.broadcast %cst_30 : f32 to vector<8x8xf32>
    %51 = arith.select %39, %49, %50 : vector<8x8xi1>, vector<8x8xf32>
    %52 = vector.shape_cast %51 : vector<8x8xf32> to vector<1x8x8xf32>
    %cst_31 = arith.constant dense<0.000000e+00> : vector<1xf32>
    %53 = vector.multi_reduction <add>, %52, %cst_31 [1, 2] : vector<1x8x8xf32> to vector<1xf32>
    %54 = vector.shape_cast %53 : vector<1xf32> to vector<1x1x1xf32>
    %55 = vector.extract %54[0, 0, 0] : f32 from vector<1x1x1xf32>
    %cst_32 = arith.constant 0.000000e+00 : f32
    %56 = arith.addf %cst_32, %55 : f32
    %57 = arith.extui %39 : vector<8x8xi1> to vector<8x8xi32>
    %58 = arith.sitofp %57 : vector<8x8xi32> to vector<8x8xf32>
    %59 = vector.shape_cast %58 : vector<8x8xf32> to vector<1x8x8xf32>
    %cst_33 = arith.constant dense<0.000000e+00> : vector<1xf32>
    %60 = vector.multi_reduction <add>, %59, %cst_33 [1, 2] : vector<1x8x8xf32> to vector<1xf32>
    %61 = vector.shape_cast %60 : vector<1xf32> to vector<1x1x1xf32>
    %62 = vector.extract %61[0, 0, 0] : f32 from vector<1x1x1xf32>
    %cst_34 = arith.constant 0.000000e+00 : f32
    %63 = arith.addf %cst_34, %62 : f32
    %cst_35 = arith.constant dense<0.000000e+00> : vector<4x8xf32>
    %64 = tpu.matmul %2, %35, %cst_35 {dimension_numbers = #tpu.dot_dimension_numbers<[1], [0], [0], [1], [0, 0, 1, 1], [], []>} : vector<4x8xf32>, vector<8x8xf32>, vector<4x8xf32> -> vector<4x8xf32>
    %cst_36 = arith.constant dense<0.000000e+00> : vector<4x4xf32>
    %65 = tpu.matmul %64, %3, %cst_36 {dimension_numbers = #tpu.dot_dimension_numbers<[1], [0], [0], [1], [0, 0, 1, 1], [], []>} : vector<4x8xf32>, vector<8x4xf32>, vector<4x4xf32> -> vector<4x4xf32>
    %c0_37 = arith.constant 0 : index
    %c0_38 = arith.constant 0 : index
    %c0_39 = arith.constant 0 : index
    %66 = vector.load %arg4[%c0_37, %c0_38, %c0_39] : memref<2x4x4xf32, #tpu.memory_space<vmem>>, vector<1x4x4xf32>
    %67 = vector.shape_cast %66 : vector<1x4x4xf32> to vector<4x4xf32>
    %cst_40 = arith.constant 1.920000e+02 : f32
    %68 = vector.broadcast %cst_40 : f32 to vector<4x4xf32>
    %69 = arith.cmpf olt, %65, %68 : vector<4x4xf32>
    %70 = arith.subf %67, %65 : vector<4x4xf32>
    %71 = math.absf %70 : vector<4x4xf32>
    %cst_41 = arith.constant 1.000000e+00 : f32
    %72 = vector.broadcast %cst_41 : f32 to vector<4x4xf32>
    %73 = arith.cmpf olt, %71, %72 : vector<4x4xf32>
    %cst_42 = arith.constant 5.000000e-01 : f32
    %74 = vector.broadcast %cst_42 : f32 to vector<4x4xf32>
    %75 = arith.mulf %74, %70 : vector<4x4xf32>
    %76 = arith.mulf %75, %70 : vector<4x4xf32>
    %cst_43 = arith.constant 5.000000e-01 : f32
    %77 = vector.broadcast %cst_43 : f32 to vector<4x4xf32>
    %78 = arith.subf %71, %77 : vector<4x4xf32>
    %79 = arith.select %73, %76, %78 : vector<4x4xi1>, vector<4x4xf32>
    %cst_44 = arith.constant 0.000000e+00 : f32
    %80 = vector.broadcast %cst_44 : f32 to vector<4x4xf32>
    %81 = arith.select %69, %79, %80 : vector<4x4xi1>, vector<4x4xf32>
    %82 = vector.shape_cast %81 : vector<4x4xf32> to vector<1x4x4xf32>
    %cst_45 = arith.constant dense<0.000000e+00> : vector<1xf32>
    %83 = vector.multi_reduction <add>, %82, %cst_45 [1, 2] : vector<1x4x4xf32> to vector<1xf32>
    %84 = vector.shape_cast %83 : vector<1xf32> to vector<1x1x1xf32>
    %85 = vector.extract %84[0, 0, 0] : f32 from vector<1x1x1xf32>
    %cst_46 = arith.constant 0.000000e+00 : f32
    %86 = arith.addf %cst_46, %85 : f32
    %87 = arith.extui %69 : vector<4x4xi1> to vector<4x4xi32>
    %88 = arith.sitofp %87 : vector<4x4xi32> to vector<4x4xf32>
    %89 = vector.shape_cast %88 : vector<4x4xf32> to vector<1x4x4xf32>
    %cst_47 = arith.constant dense<0.000000e+00> : vector<1xf32>
    %90 = vector.multi_reduction <add>, %89, %cst_47 [1, 2] : vector<1x4x4xf32> to vector<1xf32>
    %91 = vector.shape_cast %90 : vector<1xf32> to vector<1x1x1xf32>
    %92 = vector.extract %91[0, 0, 0] : f32 from vector<1x1x1xf32>
    %cst_48 = arith.constant 0.000000e+00 : f32
    %93 = arith.addf %cst_48, %92 : f32
    %c1 = arith.constant 1 : index
    %c0_49 = arith.constant 0 : index
    %c0_50 = arith.constant 0 : index
    %94 = vector.load %arg1[%c1, %c0_49, %c0_50] : memref<2x16x16xf32, #tpu.memory_space<vmem>>, vector<1x16x16xf32>
    %95 = vector.shape_cast %94 : vector<1x16x16xf32> to vector<16x16xf32>
    %c1_51 = arith.constant 1 : index
    %c0_52 = arith.constant 0 : index
    %c0_53 = arith.constant 0 : index
    %96 = vector.load %arg2[%c1_51, %c0_52, %c0_53] : memref<2x16x16xf32, #tpu.memory_space<vmem>>, vector<1x16x16xf32>
    %97 = vector.shape_cast %96 : vector<1x16x16xf32> to vector<16x16xf32>
    %cst_54 = arith.constant 1.920000e+02 : f32
    %98 = vector.broadcast %cst_54 : f32 to vector<16x16xf32>
    %99 = arith.cmpf olt, %95, %98 : vector<16x16xf32>
    %100 = arith.subf %97, %95 : vector<16x16xf32>
    %101 = math.absf %100 : vector<16x16xf32>
    %cst_55 = arith.constant 1.000000e+00 : f32
    %102 = vector.broadcast %cst_55 : f32 to vector<16x16xf32>
    %103 = arith.cmpf olt, %101, %102 : vector<16x16xf32>
    %cst_56 = arith.constant 5.000000e-01 : f32
    %104 = vector.broadcast %cst_56 : f32 to vector<16x16xf32>
    %105 = arith.mulf %104, %100 : vector<16x16xf32>
    %106 = arith.mulf %105, %100 : vector<16x16xf32>
    %cst_57 = arith.constant 5.000000e-01 : f32
    %107 = vector.broadcast %cst_57 : f32 to vector<16x16xf32>
    %108 = arith.subf %101, %107 : vector<16x16xf32>
    %109 = arith.select %103, %106, %108 : vector<16x16xi1>, vector<16x16xf32>
    %cst_58 = arith.constant 0.000000e+00 : f32
    %110 = vector.broadcast %cst_58 : f32 to vector<16x16xf32>
    %111 = arith.select %99, %109, %110 : vector<16x16xi1>, vector<16x16xf32>
    %112 = vector.shape_cast %111 : vector<16x16xf32> to vector<1x16x16xf32>
    %cst_59 = arith.constant dense<0.000000e+00> : vector<1xf32>
    %113 = vector.multi_reduction <add>, %112, %cst_59 [1, 2] : vector<1x16x16xf32> to vector<1xf32>
    %114 = vector.shape_cast %113 : vector<1xf32> to vector<1x1x1xf32>
    %115 = vector.extract %114[0, 0, 0] : f32 from vector<1x1x1xf32>
    %116 = arith.addf %26, %115 : f32
    %117 = arith.extui %99 : vector<16x16xi1> to vector<16x16xi32>
    %118 = arith.sitofp %117 : vector<16x16xi32> to vector<16x16xf32>
    %119 = vector.shape_cast %118 : vector<16x16xf32> to vector<1x16x16xf32>
    %cst_60 = arith.constant dense<0.000000e+00> : vector<1xf32>
    %120 = vector.multi_reduction <add>, %119, %cst_60 [1, 2] : vector<1x16x16xf32> to vector<1xf32>
    %121 = vector.shape_cast %120 : vector<1xf32> to vector<1x1x1xf32>
    %122 = vector.extract %121[0, 0, 0] : f32 from vector<1x1x1xf32>
    %123 = arith.addf %33, %122 : f32
    %cst_61 = arith.constant dense<0.000000e+00> : vector<8x16xf32>
    %124 = tpu.matmul %0, %95, %cst_61 {dimension_numbers = #tpu.dot_dimension_numbers<[1], [0], [0], [1], [0, 0, 1, 1], [], []>} : vector<8x16xf32>, vector<16x16xf32>, vector<8x16xf32> -> vector<8x16xf32>
    %cst_62 = arith.constant dense<0.000000e+00> : vector<8x8xf32>
    %125 = tpu.matmul %124, %1, %cst_62 {dimension_numbers = #tpu.dot_dimension_numbers<[1], [0], [0], [1], [0, 0, 1, 1], [], []>} : vector<8x16xf32>, vector<16x8xf32>, vector<8x8xf32> -> vector<8x8xf32>
    %c1_63 = arith.constant 1 : index
    %c0_64 = arith.constant 0 : index
    %c0_65 = arith.constant 0 : index
    %126 = vector.load %arg3[%c1_63, %c0_64, %c0_65] : memref<2x8x8xf32, #tpu.memory_space<vmem>>, vector<1x8x8xf32>
    %127 = vector.shape_cast %126 : vector<1x8x8xf32> to vector<8x8xf32>
    %cst_66 = arith.constant 1.920000e+02 : f32
    %128 = vector.broadcast %cst_66 : f32 to vector<8x8xf32>
    %129 = arith.cmpf olt, %125, %128 : vector<8x8xf32>
    %130 = arith.subf %127, %125 : vector<8x8xf32>
    %131 = math.absf %130 : vector<8x8xf32>
    %cst_67 = arith.constant 1.000000e+00 : f32
    %132 = vector.broadcast %cst_67 : f32 to vector<8x8xf32>
    %133 = arith.cmpf olt, %131, %132 : vector<8x8xf32>
    %cst_68 = arith.constant 5.000000e-01 : f32
    %134 = vector.broadcast %cst_68 : f32 to vector<8x8xf32>
    %135 = arith.mulf %134, %130 : vector<8x8xf32>
    %136 = arith.mulf %135, %130 : vector<8x8xf32>
    %cst_69 = arith.constant 5.000000e-01 : f32
    %137 = vector.broadcast %cst_69 : f32 to vector<8x8xf32>
    %138 = arith.subf %131, %137 : vector<8x8xf32>
    %139 = arith.select %133, %136, %138 : vector<8x8xi1>, vector<8x8xf32>
    %cst_70 = arith.constant 0.000000e+00 : f32
    %140 = vector.broadcast %cst_70 : f32 to vector<8x8xf32>
    %141 = arith.select %129, %139, %140 : vector<8x8xi1>, vector<8x8xf32>
    %142 = vector.shape_cast %141 : vector<8x8xf32> to vector<1x8x8xf32>
    %cst_71 = arith.constant dense<0.000000e+00> : vector<1xf32>
    %143 = vector.multi_reduction <add>, %142, %cst_71 [1, 2] : vector<1x8x8xf32> to vector<1xf32>
    %144 = vector.shape_cast %143 : vector<1xf32> to vector<1x1x1xf32>
    %145 = vector.extract %144[0, 0, 0] : f32 from vector<1x1x1xf32>
    %146 = arith.addf %56, %145 : f32
    %147 = arith.extui %129 : vector<8x8xi1> to vector<8x8xi32>
    %148 = arith.sitofp %147 : vector<8x8xi32> to vector<8x8xf32>
    %149 = vector.shape_cast %148 : vector<8x8xf32> to vector<1x8x8xf32>
    %cst_72 = arith.constant dense<0.000000e+00> : vector<1xf32>
    %150 = vector.multi_reduction <add>, %149, %cst_72 [1, 2] : vector<1x8x8xf32> to vector<1xf32>
    %151 = vector.shape_cast %150 : vector<1xf32> to vector<1x1x1xf32>
    %152 = vector.extract %151[0, 0, 0] : f32 from vector<1x1x1xf32>
    %153 = arith.addf %63, %152 : f32
    %cst_73 = arith.constant dense<0.000000e+00> : vector<4x8xf32>
    %154 = tpu.matmul %2, %125, %cst_73 {dimension_numbers = #tpu.dot_dimension_numbers<[1], [0], [0], [1], [0, 0, 1, 1], [], []>} : vector<4x8xf32>, vector<8x8xf32>, vector<4x8xf32> -> vector<4x8xf32>
    %cst_74 = arith.constant dense<0.000000e+00> : vector<4x4xf32>
    %155 = tpu.matmul %154, %3, %cst_74 {dimension_numbers = #tpu.dot_dimension_numbers<[1], [0], [0], [1], [0, 0, 1, 1], [], []>} : vector<4x8xf32>, vector<8x4xf32>, vector<4x4xf32> -> vector<4x4xf32>
    %c1_75 = arith.constant 1 : index
    %c0_76 = arith.constant 0 : index
    %c0_77 = arith.constant 0 : index
    %156 = vector.load %arg4[%c1_75, %c0_76, %c0_77] : memref<2x4x4xf32, #tpu.memory_space<vmem>>, vector<1x4x4xf32>
    %157 = vector.shape_cast %156 : vector<1x4x4xf32> to vector<4x4xf32>
    %cst_78 = arith.constant 1.920000e+02 : f32
    %158 = vector.broadcast %cst_78 : f32 to vector<4x4xf32>
    %159 = arith.cmpf olt, %155, %158 : vector<4x4xf32>
    %160 = arith.subf %157, %155 : vector<4x4xf32>
    %161 = math.absf %160 : vector<4x4xf32>
    %cst_79 = arith.constant 1.000000e+00 : f32
    %162 = vector.broadcast %cst_79 : f32 to vector<4x4xf32>
    %163 = arith.cmpf olt, %161, %162 : vector<4x4xf32>
    %cst_80 = arith.constant 5.000000e-01 : f32
    %164 = vector.broadcast %cst_80 : f32 to vector<4x4xf32>
    %165 = arith.mulf %164, %160 : vector<4x4xf32>
    %166 = arith.mulf %165, %160 : vector<4x4xf32>
    %cst_81 = arith.constant 5.000000e-01 : f32
    %167 = vector.broadcast %cst_81 : f32 to vector<4x4xf32>
    %168 = arith.subf %161, %167 : vector<4x4xf32>
    %169 = arith.select %163, %166, %168 : vector<4x4xi1>, vector<4x4xf32>
    %cst_82 = arith.constant 0.000000e+00 : f32
    %170 = vector.broadcast %cst_82 : f32 to vector<4x4xf32>
    %171 = arith.select %159, %169, %170 : vector<4x4xi1>, vector<4x4xf32>
    %172 = vector.shape_cast %171 : vector<4x4xf32> to vector<1x4x4xf32>
    %cst_83 = arith.constant dense<0.000000e+00> : vector<1xf32>
    %173 = vector.multi_reduction <add>, %172, %cst_83 [1, 2] : vector<1x4x4xf32> to vector<1xf32>
    %174 = vector.shape_cast %173 : vector<1xf32> to vector<1x1x1xf32>
    %175 = vector.extract %174[0, 0, 0] : f32 from vector<1x1x1xf32>
    %176 = arith.addf %86, %175 : f32
    %177 = arith.extui %159 : vector<4x4xi1> to vector<4x4xi32>
    %178 = arith.sitofp %177 : vector<4x4xi32> to vector<4x4xf32>
    %179 = vector.shape_cast %178 : vector<4x4xf32> to vector<1x4x4xf32>
    %cst_84 = arith.constant dense<0.000000e+00> : vector<1xf32>
    %180 = vector.multi_reduction <add>, %179, %cst_84 [1, 2] : vector<1x4x4xf32> to vector<1xf32>
    %181 = vector.shape_cast %180 : vector<1xf32> to vector<1x1x1xf32>
    %182 = vector.extract %181[0, 0, 0] : f32 from vector<1x1x1xf32>
    %183 = arith.addf %93, %182 : f32
    %184 = vector.broadcast %116 : f32 to vector<1x8x128xf32>
    %c0_85 = arith.constant 0 : index
    %c0_86 = arith.constant 0 : index
    %c0_87 = arith.constant 0 : index
    %185 = vector.load %arg9[%c0_85, %c0_86, %c0_87] : memref<1x8x128xf32, #tpu.memory_space<vmem>>, vector<1x8x128xf32>
    tpu.vector_store %arg9[%c0_85, %c0_86, %c0_87], %184 {strides = array<i32>} : memref<1x8x128xf32, #tpu.memory_space<vmem>>, vector<1x8x128xf32>,
    %186 = vector.broadcast %123 : f32 to vector<1x8x128xf32>
    %c0_88 = arith.constant 0 : index
    %c0_89 = arith.constant 0 : index
    %c0_90 = arith.constant 0 : index
    %187 = vector.load %arg10[%c0_88, %c0_89, %c0_90] : memref<1x8x128xf32, #tpu.memory_space<vmem>>, vector<1x8x128xf32>
    tpu.vector_store %arg10[%c0_88, %c0_89, %c0_90], %186 {strides = array<i32>} : memref<1x8x128xf32, #tpu.memory_space<vmem>>, vector<1x8x128xf32>,
    %188 = vector.broadcast %146 : f32 to vector<1x8x128xf32>
    %c0_91 = arith.constant 0 : index
    %c0_92 = arith.constant 0 : index
    %c0_93 = arith.constant 0 : index
    %189 = vector.load %arg11[%c0_91, %c0_92, %c0_93] : memref<1x8x128xf32, #tpu.memory_space<vmem>>, vector<1x8x128xf32>
    tpu.vector_store %arg11[%c0_91, %c0_92, %c0_93], %188 {strides = array<i32>} : memref<1x8x128xf32, #tpu.memory_space<vmem>>, vector<1x8x128xf32>,
    %190 = vector.broadcast %153 : f32 to vector<1x8x128xf32>
    %c0_94 = arith.constant 0 : index
    %c0_95 = arith.constant 0 : index
    %c0_96 = arith.constant 0 : index
    %191 = vector.load %arg12[%c0_94, %c0_95, %c0_96] : memref<1x8x128xf32, #tpu.memory_space<vmem>>, vector<1x8x128xf32>
    tpu.vector_store %arg12[%c0_94, %c0_95, %c0_96], %190 {strides = array<i32>} : memref<1x8x128xf32, #tpu.memory_space<vmem>>, vector<1x8x128xf32>,
    %192 = vector.broadcast %176 : f32 to vector<1x8x128xf32>
    %c0_97 = arith.constant 0 : index
    %c0_98 = arith.constant 0 : index
    %c0_99 = arith.constant 0 : index
    %193 = vector.load %arg13[%c0_97, %c0_98, %c0_99] : memref<1x8x128xf32, #tpu.memory_space<vmem>>, vector<1x8x128xf32>
    tpu.vector_store %arg13[%c0_97, %c0_98, %c0_99], %192 {strides = array<i32>} : memref<1x8x128xf32, #tpu.memory_space<vmem>>, vector<1x8x128xf32>,
    %194 = vector.broadcast %183 : f32 to vector<1x8x128xf32>
    %c0_100 = arith.constant 0 : index
    %c0_101 = arith.constant 0 : index
    %c0_102 = arith.constant 0 : index
    %195 = vector.load %arg14[%c0_100, %c0_101, %c0_102] : memref<1x8x128xf32, #tpu.memory_space<vmem>>, vector<1x8x128xf32>
    tpu.vector_store %arg14[%c0_100, %c0_101, %c0_102], %194 {strides = array<i32>} : memref<1x8x128xf32, #tpu.memory_space<vmem>>, vector<1x8x128xf32>,
    return
  }
  func.func @transform_0(%arg0: i32) -> (i32, i32, i32) {
    %c0_i32 = arith.constant 0 : i32
    %c0_i32_0 = arith.constant 0 : i32
    %c0_i32_1 = arith.constant 0 : i32
    return %arg0, %c0_i32, %c0_i32_0 : i32, i32, i32
  }
  func.func @transform_1(%arg0: i32) -> (i32, i32, i32) {
    %c0_i32 = arith.constant 0 : i32
    %c0_i32_0 = arith.constant 0 : i32
    %c0_i32_1 = arith.constant 0 : i32
    return %arg0, %c0_i32, %c0_i32_0 : i32, i32, i32
  }
  func.func @transform_2(%arg0: i32) -> (i32, i32, i32) {
    %c0_i32 = arith.constant 0 : i32
    %c0_i32_0 = arith.constant 0 : i32
    %c0_i32_1 = arith.constant 0 : i32
    return %arg0, %c0_i32, %c0_i32_0 : i32, i32, i32
  }
  func.func @transform_3(%arg0: i32) -> (i32, i32, i32) {
    %c0_i32 = arith.constant 0 : i32
    %c0_i32_0 = arith.constant 0 : i32
    %c0_i32_1 = arith.constant 0 : i32
    return %arg0, %c0_i32, %c0_i32_0 : i32, i32, i32
  }
  func.func @transform_4(%arg0: i32) -> (i32, i32) {
    %c0_i32 = arith.constant 0 : i32
    %c0_i32_0 = arith.constant 0 : i32
    %c0_i32_1 = arith.constant 0 : i32
    return %c0_i32, %c0_i32_0 : i32, i32
  }
  func.func @transform_5(%arg0: i32) -> (i32, i32) {
    %c0_i32 = arith.constant 0 : i32
    %c0_i32_0 = arith.constant 0 : i32
    %c0_i32_1 = arith.constant 0 : i32
    return %c0_i32, %c0_i32_0 : i32, i32
  }
  func.func @transform_6(%arg0: i32) -> (i32, i32) {
    %c0_i32 = arith.constant 0 : i32
    %c0_i32_0 = arith.constant 0 : i32
    %c0_i32_1 = arith.constant 0 : i32
    return %c0_i32, %c0_i32_0 : i32, i32
  }
  func.func @transform_7(%arg0: i32) -> (i32, i32) {
    %c0_i32 = arith.constant 0 : i32
    %c0_i32_0 = arith.constant 0 : i32
    %c0_i32_1 = arith.constant 0 : i32
    return %c0_i32, %c0_i32_0 : i32, i32
  }
  func.func @transform_8(%arg0: i32) -> (i32, i32, i32) {
    %c0_i32 = arith.constant 0 : i32
    %c0_i32_0 = arith.constant 0 : i32
    %c0_i32_1 = arith.constant 0 : i32
    return %arg0, %c0_i32, %c0_i32_0 : i32, i32, i32
  }
  func.func @transform_9(%arg0: i32) -> (i32, i32, i32) {
    %c0_i32 = arith.constant 0 : i32
    %c0_i32_0 = arith.constant 0 : i32
    %c0_i32_1 = arith.constant 0 : i32
    return %arg0, %c0_i32, %c0_i32_0 : i32, i32, i32
  }
  func.func @transform_10(%arg0: i32) -> (i32, i32, i32) {
    %c0_i32 = arith.constant 0 : i32
    %c0_i32_0 = arith.constant 0 : i32
    %c0_i32_1 = arith.constant 0 : i32
    return %arg0, %c0_i32, %c0_i32_0 : i32, i32, i32
  }
  func.func @transform_11(%arg0: i32) -> (i32, i32, i32) {
    %c0_i32 = arith.constant 0 : i32
    %c0_i32_0 = arith.constant 0 : i32
    %c0_i32_1 = arith.constant 0 : i32
    return %arg0, %c0_i32, %c0_i32_0 : i32, i32, i32
  }
  func.func @transform_12(%arg0: i32) -> (i32, i32, i32) {
    %c0_i32 = arith.constant 0 : i32
    %c0_i32_0 = arith.constant 0 : i32
    %c0_i32_1 = arith.constant 0 : i32
    return %arg0, %c0_i32, %c0_i32_0 : i32, i32, i32
  }
  func.func @transform_13(%arg0: i32) -> (i32, i32, i32) {
    %c0_i32 = arith.constant 0 : i32
    %c0_i32_0 = arith.constant 0 : i32
    %c0_i32_1 = arith.constant 0 : i32
    return %arg0, %c0_i32, %c0_i32_0 : i32, i32, i32
  }
}

</mosaic_0001>

<bundles_post_ra>
// kernel: tpu_custom_call.1
= control target key start
LH: loop header
LB: loop body
LE: loop exit
PB: predicated region body
PF: predicated region fallthrough
CT: control target
= control target key end

     0   :  { %19 = vsyncpa [#allocation3], 0  ;;  %s1703_s0 = inlined_call_operand.vmem [shape: f32[2,16,16], index: 0, kind: input, shape index: {}]   ;;  %s1704_s1 = inlined_call_operand.hbm [shape: f32[2,16,16], index: 1, kind: input, shape index: {}]   ;;  %s1705_s2 = inlined_call_operand.hbm [shape: f32[2,8,8], index: 2, kind: input, shape index: {}]   ;;  %s1706_s3 = inlined_call_operand.hbm [shape: f32[2,4,4], index: 3, kind: input, shape index: {}]   ;;  %s1707_s4 = inlined_call_operand.vmem [shape: f32[8,16], index: 4, kind: input, shape index: {}]   ;;  %s1708_s5 = inlined_call_operand.vmem [shape: f32[16,8], index: 5, kind: input, shape index: {}]   ;;  %s1709_s6 = inlined_call_operand.vmem [shape: f32[4,8], index: 6, kind: input, shape index: {}]   ;;  %s1710_s7 = inlined_call_operand.vmem [shape: f32[8,4], index: 7, kind: input, shape index: {}]   ;;  %s1711_s8 = inlined_call_operand.hbm [shape: f32[1,8,128], index: 8, kind: output, shape index: {0}]   ;;  %s1712_s9 = inlined_call_operand.hbm [shape: f32[1,8,128], index: 9, kind: output, shape index: {1}]   ;;  %s1713_s10 = inlined_call_operand.hbm [shape: f32[1,8,128], index: 10, kind: output, shape index: {2}]   ;;  %s1714_s11 = inlined_call_operand.hbm [shape: f32[1,8,128], index: 11, kind: output, shape index: {3}]   ;;  %s1715_s12 = inlined_call_operand.hbm [shape: f32[1,8,128], index: 12, kind: output, shape index: {4}]   ;;  %s1716_s13 = inlined_call_operand.hbm [shape: f32[1,8,128], index: 13, kind: output, shape index: {5}]  }
   0x1   :  { %20 = vsyncpa [#allocation6], 0 }
   0x2   :  { %21 = vsyncpa [#allocation4], 0 }
   0x3   :  { %22 = vsyncpa [#allocation10], 0 }
   0x4   :  { %23 = vsyncpa [#allocation13], 0 }
   0x5   :  { %24 = vsyncpa [#allocation16], 0  ;;  %s1362_s25 = smov [#allocation5]   ;;  %s1363_s27 = smov [#allocation2]  }
   0x6   :  { %s44_s26 = sshll.u32 %s1362_s25, 4  ;;  %s32_s28 = sshll.u32 %s1363_s27, 4  ;;  %s45_s26 = int_to_ptr.vmem [resolvable:$true] %s44_s26  ;;  %s1448_s28 = int_to_ptr.vmem [resolvable:$true] %s32_s28 }
   0x7   :  { %s1152_s14 = scalar_lea.hbm %s1705_s2, 256 }
   0x8   :  { %p1153_p0 = scmp.ne.s32.totalorder %s1705_s2, %s1152_s14  ;;  %p1156_p1 = scmp.lt.u32.totalorder %s1152_s14, %s1705_s2 }
   0xa   :  { %p1158_p2 = pnand %p1156_p1, %p1153_p0 }
   0xc   :  { %1161 = shalt.err (!%p1158_p2)
}
   0xd   :  { %s1162_s19 = scalar_lea.vmem %s45_s26, 256  ;;  %p1167_p4 = scmp.lt.s32.totalorder %s45_s26, %s45_s26 }
   0xe   :  { %p1163_p3 = scmp.ne.s32.totalorder %s45_s26, %s1162_s19  ;;  %p1168_p5 = scmp.lt.s32.totalorder %s1162_s19, %s1162_s19 }
  0x10   :  { %p1169_p6 = por %p1168_p5, %p1167_p4 }
  0x12   :  { %p1170_p7 = pnand %p1169_p6, %p1163_p3 }
  0x14   :  { %1173 = shalt.err (!%p1170_p7)
}
  0x15   :  { %s1364_s20 = smov 128   ;;  %s1365_s21 = smov 8  }
  0x16   :  { %50 = dma.hbm_to_vmem [thread:$0]  %s1705_s2, 256, %s45_s26, [#allocation6], %s1364_s20, %s1364_s20, %s1365_s21  }
  0x17   :  { %s1174_s27 = scalar_lea.hbm %s1704_s1, 512 }
  0x18   :  { %p1175_p8 = scmp.ne.s32.totalorder %s1704_s1, %s1174_s27  ;;  %p1178_p9 = scmp.lt.u32.totalorder %s1174_s27, %s1704_s1 }
  0x1a   :  { %p1180_p10 = pnand %p1178_p9, %p1175_p8 }
  0x1c   :  { %1183 = shalt.err (!%p1180_p10)
}
  0x1d   :  { %s1184_s16 = scalar_lea.vmem %s1448_s28, 512  ;;  %p1189_p12 = scmp.lt.s32.totalorder %s1448_s28, %s1448_s28 }
  0x1e   :  { %p1185_p11 = scmp.ne.s32.totalorder %s1448_s28, %s1184_s16  ;;  %p1190_p13 = scmp.lt.s32.totalorder %s1184_s16, %s1184_s16 }
  0x20   :  { %p1191_p0 = por %p1190_p13, %p1189_p12 }
  0x22   :  { %p1192_p1 = pnand %p1191_p0, %p1185_p11 }
  0x24   :  { %1195 = shalt.err (!%p1192_p1)
}
  0x25   :  { %38 = dma.hbm_to_vmem [thread:$0]  %s1704_s1, 512, %s1448_s28, [#allocation3], %s1364_s20, %s1364_s20, %s1365_s21  }
  0x26   :  { %s1366_s17 = smov [#allocation7]   ;;  %s1196_s23 = scalar_lea.hbm %s1706_s3, 128 }
  0x27   :  { %s56_s18 = sshll.u32 %s1366_s17, 4  ;;  %p1197_p2 = scmp.ne.s32.totalorder %s1706_s3, %s1196_s23  ;;  %s57_s18 = int_to_ptr.vmem [resolvable:$true] %s56_s18 }
  0x28   :  { %p1200_p3 = scmp.lt.u32.totalorder %s1196_s23, %s1706_s3 }
  0x2a   :  { %p1202_p4 = pnand %p1200_p3, %p1197_p2 }
  0x2c   :  { %1205 = shalt.err (!%p1202_p4)
}
  0x2d   :  { %s1206_s30 = scalar_lea.vmem %s57_s18, 128  ;;  %p1211_p6 = scmp.lt.s32.totalorder %s57_s18, %s57_s18 }
  0x2e   :  { %p1207_p5 = scmp.ne.s32.totalorder %s57_s18, %s1206_s30  ;;  %p1212_p7 = scmp.lt.s32.totalorder %s1206_s30, %s1206_s30 }
  0x30   :  { %p1213_p8 = por %p1212_p7, %p1211_p6 }
  0x32   :  { %p1214_p9 = pnand %p1213_p8, %p1207_p5 }
  0x34   :  { %1217 = shalt.err (!%p1214_p9)
}
  0x35   :  { %s1367_s1 = smov 64   ;;  %s1368_s28 = smov 4  }
  0x36   :  { %62 = dma.hbm_to_vmem [thread:$0]  %s1706_s3, 128, %s57_s18, [#allocation6], %s1367_s1, %s1367_s1, %s1368_s28  }
  0x37   :  { %1350 = dma.done.wait [#allocation3], 512  }
  0x38   :  { %1351 = vsyncadd [#allocation3], 4294966784 }
  0x39   :  { %1352 = dma.done.wait [#allocation6], 384  }
  0x3a   :  { %1353 = vsyncadd [#allocation6], 4294966912  ;;  %v1369_v0 = vmov 0.0|0.0   ;;  %vm1370_vm0 = vmmov 0   ;;  %v1371_v1 = vmov 0.0   ;;  %v85_v2 = vld [vmem:[%s1703_s0] sm:$0xff] }
  0x3b   :  { %1100 = vmatprep.subr.bf16.mxu0 %v1369_v0  ;;  %1056 = vmatprep.mubr.msk.f32.mxu0 %vm1370_vm0, %v1371_v1  ;;  %v86_v3 = vld [vmem:[%s1703_s0 + $0x8] sm:$0xff]  ;;  %v81_v5 = vld [vmem:[%s1708_s5] sm:$0xff]  ;;  %vm107_vm1 = vcmask 130048   ;;  %v1526_v9 = vld [vmem:[%s1703_s0 + $0x10] sm:$0xff]  ;;  %vm89_vm4 = vcmp.lt.f32.partialorder %v85_v2, 192.0  ;;  %vm294_vm8 = vcmask 64512  }
  0x3c   :  { %1103 = vmatprep.subr.bf16.mxu1 %v1369_v0  ;;  %1063 = vmatprep.mubr.msk.f32.mxu1 %vm1370_vm0, %v1371_v1  ;;  %v1101_v4 = vpack.c.bf16 %v86_v3, %v85_v2  ;;  %v82_v6 = vld [vmem:[%s1708_s5 + $0x8] sm:$0xff]  ;;  %v1512_v7 = vld [vmem:[%s1707_s4] sm:$0xff]  ;;  %v1531_v10 = vld [vmem:[%s1703_s0 + $0x18] sm:$0xff]  ;;  %vm506_vm2 = vcmp.lt.f32.partialorder %v1526_v9, 192.0  ;;  %vm90_vm5 = vcmp.lt.f32.partialorder %v86_v3, 192.0  ;;  %v1008_v24 = vsel %vm89_vm4, 1.0, %v1371_v1 }
  0x3d   :  { %v1514_v8 = vpack.c.bf16 %v82_v6, %v81_v5  ;;  %vm507_vm3 = vcmp.lt.f32.partialorder %v1531_v10, 192.0  ;;  %v1022_v11 = vsel %vm506_vm2, 1.0, %v1371_v1  ;;  %v87_v18 = vld [vmem:[#allocation2] sm:$0xff]  ;;  %v88_v19 = vld [vmem:[#allocation2 + $0x8] sm:$0xff]  ;;  %v1009_v25 = vsel %vm90_vm5, 1.0, %v1371_v1  ;;  %s1372_s18 = smov [#allocation9]  }
  0x3e   :  { %1102 = vmatpush3.bf16.msra.mxu0 %v1101_v4  ;;  %v1023_v12 = vsel %vm507_vm3, 1.0, %v1371_v1  ;;  %v541_v13 = vsel %vm107_vm1, %v1022_v11, 0.0  ;;  %v91_v20 = vsub.f32 %v87_v18, %v85_v2  ;;  %v92_v21 = vsub.f32 %v88_v19, %v86_v3  ;;  %v284_v42 = vld [vmem:[#allocation5] sm:$0xff]  ;;  %s938_s19 = sshll.u32 %s1372_s18, 4  ;;  %s1373_s22 = smov [#allocation12]   ;;  %s939_s19 = int_to_ptr.vmem [resolvable:$true] %s938_s19 }
  0x3f   :  { %1066 = vmatprep.subr.mxu0 %v1371_v1  ;;  %1105 = vmatpush3.bf16.msra.mxu1 %v1514_v8  ;;  %v542_v14 = vsel %vm107_vm1, %v1023_v12, 0.0  ;;  %v125_v28 = vsel %vm107_vm1, %v1008_v24, 0.0  ;;  %v126_v29 = vsel %vm107_vm1, %v1009_v25, 0.0  ;;  %v1559_v43 = vld [vmem:[%s1709_s6] sm:$0xf]  ;;  %v1107_v44 = vpack.c.bf16 %v1531_v10, %v1526_v9  ;;  %s958_s5 = sshll.u32 %s1373_s22, 4  ;;  %p1223_p11 = scmp.lt.s32.totalorder %s939_s19, %s939_s19  ;;  %s959_s5 = int_to_ptr.vmem [resolvable:$true] %s958_s5 }
  0x40   :  { %1071 = vmatprep.subr.mxu1 %v1371_v1  ;;  %v543_v15 = vadd.f32 %v542_v14, %v541_v13  ;;  %v97_v22 = vmul.f32 0.5, %v91_v20  ;;  %v98_v23 = vmul.f32 0.5, %v92_v21  ;;  %v93_v26 = vand.u32 2147483647, %v91_v20  ;;  %v84_v12 = vld [vmem:[%s1710_s7] sm:$0xff]  ;;  %s1218_s23 = scalar_lea.vmem %s939_s19, 128 }
  0x41   :  { %1057 = vmatmul.mubr.msk.f32.vlgmr.msra.gmra.mrb[0].mxu0 %vm107_vm1, %v1512_v7  ;;  %v94_v27 = vand.u32 2147483647, %v92_v21  ;;  %v127_v32 = vadd.f32 %v126_v29, %v125_v28  ;;  %vm475_vm13 = vcmask 27648   ;;  %p1219_p10 = scmp.ne.s32.totalorder %s939_s19, %s1218_s23  ;;  %p1224_p12 = scmp.lt.s32.totalorder %s1218_s23, %s1218_s23 }
  0x42   :  { %1068 = vmatprep.mubr.msk.f32.mxu0 %vm1370_vm0, %v1371_v1  ;;  %544 = vadd.xlane.f32.xlu1 %v543_v15  ;;  %v99_v30 = vmul.f32 %v97_v22, %v91_v20  ;;  %v100_v31 = vmul.f32 %v98_v23, %v92_v21  ;;  %vm95_vm6 = vcmp.lt.f32.partialorder %v93_v26, 1.0  ;;  %v1006_v33 = vadd.f32 -0.5, %v93_v26 }
  0x43   :  { %vm96_vm7 = vcmp.lt.f32.partialorder %v94_v27, 1.0  ;;  %v1007_v34 = vadd.f32 -0.5, %v94_v27  ;;  %128 = vadd.xlane.f32.xlu0 %v127_v32  ;;  %v505_v32 = vld [vmem:[#allocation2 + $0x18] sm:$0xff]  ;;  %p1225_p13 = por %p1224_p12, %p1223_p11 }
  0x44   :  { %v103_v35 = vsel %vm95_vm6, %v99_v30, %v1006_v33 }
  0x45   :  { %v104_v36 = vsel %vm96_vm7, %v100_v31, %v1007_v34  ;;  %v105_v37 = vsel %vm89_vm4, %v103_v35, 0.0  ;;  %v504_v31 = vld [vmem:[#allocation2 + $0x10] sm:$0xff]  ;;  %v509_v34 = vsub.f32 %v505_v32, %v1531_v10  ;;  %p1226_p0 = pnand %p1225_p13, %p1219_p10 }
  0x46   :  { %v106_v38 = vsel %vm90_vm5, %v104_v36, 0.0  ;;  %v108_v39 = vsel %vm107_vm1, %v105_v37, 0.0  ;;  %v508_v33 = vsub.f32 %v504_v31, %v1526_v9  ;;  %v698_v9 = vld [vmem:[#allocation5 + $0x8] sm:$0xff] }
  0x47   :  { %v109_v40 = vsel %vm107_vm1, %v106_v38, 0.0  ;;  %v511_v35 = vand.u32 2147483647, %v509_v34  ;;  %v515_v37 = vmul.f32 0.5, %v509_v34 }
  0x48   :  { %v110_v41 = vadd.f32 %v109_v40, %v108_v39  ;;  %v514_v36 = vmul.f32 0.5, %v508_v33 }
  0x49   :  { %v517_v39 = vmul.f32 %v515_v37, %v509_v34  ;;  %vm513_vm12 = vcmp.lt.f32.partialorder %v511_v35, 1.0 }
  0x4a   :  { %111 = vadd.xlane.f32.xlu0 %v110_v41  ;;  %v516_v38 = vmul.f32 %v514_v36, %v508_v33  ;;  %v1021_v41 = vadd.f32 -0.5, %v511_v35 }
  0xcf   :  { %v1582_v13 = vpop.xlane.xlu1 %544 }
  0xd0   :  { %v129_v57 = vpop.xlane.xlu0 %128 }
  0xd1   :  { %v130_v58 = vrot.slane %v129_v57, 4 }
  0xd3   :  { %v131_v59 = vadd.f32 %v130_v58, %v129_v57 }
  0xd5   :  { %v132_v61 = vrot.slane %v131_v59, 2 }
  0xd7   :  { %v112_v60 = vpop.xlane.xlu0 %111  ;;  %v133_v2 = vadd.f32 %v132_v61, %v131_v59 }
  0xd8   :  { %v113_v62 = vrot.slane %v112_v60, 4 }
  0xd9   :  { %v134_v4 = vrot.slane %v133_v2, 1 }
  0xda   :  { %v114_v63 = vadd.f32 %v113_v62, %v112_v60 }
  0xdc   :  { %v115_v3 = vrot.slane %v114_v63, 2 }
  0xde   :  { %v116_v5 = vadd.f32 %v115_v3, %v114_v63 }
  0xe0   :  { %v117_v6 = vrot.slane %v116_v5, 1 }
  0xe2   :  { %v118_v11 = vadd.f32 %v117_v6, %v116_v5 }
  0xe4   :  { %1112 = vpush %v118_v11 }
 0x114   :  { %v207_v16 = vpop.f32.mrb[0].mxu0 }
 0x115   :  { %v1058_v17 = vpop.f32.mrb[1].mxu0  ;;  %1064 = vmatmul.mubr.msk.f32.vlgmr.msra.gmra.mrb[0].mxu1 %vm107_vm1, %v207_v16  ;;  %s1113_s7 = spop %1112 }
 0x116   :  { %1073 = vmatprep.mubr.msk.f32.mxu1 %vm1370_vm0, %v1371_v1  ;;  %1072 = vmatpush3.msra.mxu1 %v84_v12 }
 0x117   :  { %1109 = vmatprep.subr.bf16.mxu1 %v1369_v0 }
 0x1e8   :  { %v280_v45 = vpop.f32.mrb[0].mxu1 }
 0x1e9   :  { %v286_v46 = vsub.f32 %v284_v42, %v280_v45  ;;  %v1065_v47 = vpop.f32.mrb[1].mxu1  ;;  %1067 = vmatpush3.msra.mxu0 %v280_v45  ;;  %vm285_vm9 = vcmp.lt.f32.partialorder %v280_v45, 192.0 }
 0x1ea   :  { %1069 = vmatmul.mubr.msk.f32.vlgmr.msra.gmra.mrb[2].mxu0 %vm294_vm8, %v1559_v43  ;;  %1106 = vmatprep.subr.bf16.mxu0 %v1369_v0  ;;  %v1013_v48 = vsel %vm285_vm9, 1.0, %v1371_v1 }
 0x1eb   :  { %v289_v49 = vmul.f32 0.5, %v286_v46  ;;  %1108 = vmatpush3.bf16.msra.mxu0 %v1107_v44  ;;  %v308_v50 = vsel %vm294_vm8, %v1013_v48, 0.0  ;;  %1080 = vmatprep.mubr.msk.f32.mxu0 %vm1370_vm0, %v1371_v1  ;;  %v287_v51 = vand.u32 2147483647, %v286_v46  ;;  %v521_v44 = vsel %vm513_vm12, %v517_v39, %v1021_v41 }
 0x1ec   :  { %309 = vadd.xlane.f32.xlu1 %v308_v50  ;;  %1090 = vmatprep.subr.mxu0 %v1371_v1  ;;  %v465_v50 = vld [vmem:[#allocation7] sm:$0xf] }
 0x1ed   :  { %vm288_vm10 = vcmp.lt.f32.partialorder %v287_v51, 1.0  ;;  %v290_v52 = vmul.f32 %v289_v49, %v286_v46  ;;  %v1012_v53 = vadd.f32 -0.5, %v287_v51  ;;  %v523_v46 = vsel %vm507_vm3, %v521_v44, 0.0 }
 0x1ee   :  { %1081 = vmatmul.mubr.msk.f32.vlgmr.msra.gmra.mrb[4].mxu0 %vm107_vm1, %v1512_v7  ;;  %v135_v7 = vadd.f32 %v134_v4, %v133_v2  ;;  %v525_v48 = vsel %vm107_vm1, %v523_v46, 0.0 }
 0x1ef   :  { %v292_v54 = vsel %vm288_vm10, %v290_v52, %v1012_v53  ;;  %1092 = vmatprep.mubr.msk.f32.mxu0 %vm1370_vm0, %v1371_v1 }
 0x1f0   :  { %v293_v55 = vsel %vm285_vm9, %v292_v54, 0.0  ;;  %1114 = vpush %v135_v7 }
 0x1f1   :  { %v295_v56 = vsel %vm294_vm8, %v293_v55, 0.0 }
 0x1f2   :  { %296 = vadd.xlane.f32.xlu1 %v295_v56 }
 0x221   :  { %s1115_s29 = spop %1114 }
 0x279   :  { %v310_v14 = vpop.xlane.xlu1 %309 }
 0x27a   :  { %v311_v15 = vrot.slane %v310_v14, 4 }
 0x27c   :  { %v312_v16 = vadd.f32 %v311_v15, %v310_v14 }
 0x27e   :  { %v313_v17 = vrot.slane %v312_v16, 2 }
 0x27f   :  { %v297_v18 = vpop.xlane.xlu1 %296 }
 0x280   :  { %v298_v19 = vrot.slane %v297_v18, 4  ;;  %v314_v21 = vadd.f32 %v313_v17, %v312_v16  ;;  %v546_v17 = vrot.slane %v1582_v13, 4 }
 0x282   :  { %v299_v20 = vadd.f32 %v298_v19, %v297_v18  ;;  %v315_v24 = vrot.slane %v314_v21, 1 }
 0x284   :  { %v300_v22 = vrot.slane %v299_v20, 2  ;;  %v316_v27 = vadd.f32 %v315_v24, %v314_v21  ;;  %v547_v21 = vadd.f32 %v546_v17, %v1582_v13 }
 0x286   :  { %v301_v23 = vadd.f32 %v300_v22, %v299_v20 }
 0x288   :  { %v302_v25 = vrot.slane %v301_v23, 1 }
 0x28a   :  { %v303_v26 = vadd.f32 %v302_v25, %v301_v23 }
 0x28c   :  { %1116 = vpush %v303_v26  ;;  %v548_v26 = vrot.slane %v547_v21, 2 }
 0x28d   :  { %1118 = vpush %v316_v27 }
 0x2bd   :  { %v388_v28 = vpop.f32.mrb[2].mxu0  ;;  %s1117_s30 = spop %1116 }
 0x2be   :  { %v1070_v0 = vpop.f32.mrb[3].mxu0  ;;  %1074 = vmatmul.mubr.msk.f32.vlgmr.msra.gmra.mrb[2].mxu1 %vm294_vm8, %v388_v28  ;;  %s1119_s1 = spop %1118 }
 0x2bf   :  { %1111 = vmatpush3.bf16.msra.mxu1 %v1514_v8  ;;  %1087 = vmatprep.mubr.msk.f32.mxu1 %vm1370_vm0, %v1371_v1  ;;  %v510_v8 = vand.u32 2147483647, %v508_v33 }
 0x2c0   :  { %1095 = vmatprep.subr.mxu1 %v1371_v1 }
 0x2c1   :  { %v620_v29 = vpop.f32.mrb[4].mxu0  ;;  %v1020_v40 = vadd.f32 -0.5, %v510_v8  ;;  %vm512_vm11 = vcmp.lt.f32.partialorder %v510_v8, 1.0  ;;  %v549_v8 = vadd.f32 %v548_v26, %v547_v21 }
 0x2c2   :  { %v1082_v30 = vpop.f32.mrb[5].mxu0  ;;  %1088 = vmatmul.mubr.msk.f32.vlgmr.msra.gmra.mrb[4].mxu1 %vm107_vm1, %v620_v29 }
 0x2c3   :  { %1096 = vmatpush3.msra.mxu1 %v84_v12  ;;  %1097 = vmatprep.mubr.msk.f32.mxu1 %vm1370_vm0, %v1371_v1  ;;  %v520_v42 = vsel %vm512_vm11, %v516_v38, %v1020_v40  ;;  %v550_v40 = vrot.slane %v549_v8, 1 }
 0x2c4   :  { %v522_v45 = vsel %vm506_vm2, %v520_v42, 0.0 }
 0x2c5   :  { %v524_v47 = vsel %vm107_vm1, %v522_v45, 0.0 }
 0x2c6   :  { %v526_v49 = vadd.f32 %v525_v48, %v524_v47 }
 0x2c8   :  { %527 = vadd.xlane.f32.xlu0 %v526_v49  ;;  %v551_v49 = vadd.f32 %v550_v40, %v549_v8 }
 0x355   :  { %v528_v15 = vpop.xlane.xlu0 %527 }
 0x356   :  { %v529_v16 = vrot.slane %v528_v15, 4 }
 0x358   :  { %v530_v20 = vadd.f32 %v529_v16, %v528_v15 }
 0x35a   :  { %v531_v25 = vrot.slane %v530_v20, 2 }
 0x35c   :  { %v532_v31 = vadd.f32 %v531_v25, %v530_v20 }
 0x35e   :  { %v533_v13 = vrot.slane %v532_v31, 1 }
 0x360   :  { %v534_v46 = vadd.f32 %v533_v13, %v532_v31 }
 0x391   :  { %v461_v51 = vpop.f32.mrb[2].mxu1 }
 0x392   :  { %vm466_vm14 = vcmp.lt.f32.partialorder %v461_v51, 192.0  ;;  %v467_v52 = vsub.f32 %v465_v50, %v461_v51  ;;  %v1075_v53 = vpop.f32.mrb[3].mxu1 }
 0x393   :  { %v1017_v54 = vsel %vm466_vm14, 1.0, %v1371_v1 }
 0x394   :  { %v468_v55 = vand.u32 2147483647, %v467_v52  ;;  %v470_v56 = vmul.f32 0.5, %v467_v52  ;;  %v489_v10 = vsel %vm475_vm13, %v1017_v54, 0.0 }
 0x395   :  { %490 = vadd.xlane.f32.xlu1 %v489_v10  ;;  %v693_v57 = vpop.f32.mrb[4].mxu1 }
 0x396   :  { %v471_v58 = vmul.f32 %v470_v56, %v467_v52  ;;  %v700_v59 = vsub.f32 %v698_v9, %v693_v57  ;;  %v1089_v60 = vpop.f32.mrb[5].mxu1  ;;  %1091 = vmatpush3.msra.mxu0 %v693_v57  ;;  %vm699_vm15 = vcmp.lt.f32.partialorder %v693_v57, 192.0  ;;  %vm469_vm0 = vcmp.lt.f32.partialorder %v468_v55, 1.0 }
 0x397   :  { %1093 = vmatmul.mubr.msk.f32.vlgmr.msra.gmra.mrb[6].mxu0 %vm294_vm8, %v1559_v43  ;;  %v1027_v61 = vsel %vm699_vm15, 1.0, %v1371_v1  ;;  %v1016_v62 = vadd.f32 -0.5, %v468_v55 }
 0x398   :  { %v703_v63 = vmul.f32 0.5, %v700_v59  ;;  %v721_v2 = vsel %vm294_vm8, %v1027_v61, 0.0  ;;  %v701_v3 = vand.u32 2147483647, %v700_v59 }
 0x399   :  { %722 = vadd.xlane.f32.xlu1 %v721_v2  ;;  %v473_v4 = vsel %vm469_vm0, %v471_v58, %v1016_v62  ;;  %v876_v58 = vld [vmem:[#allocation7 + $0x4] sm:$0xf] }
 0x39a   :  { %v474_v5 = vsel %vm466_vm14, %v473_v4, 0.0  ;;  %vm702_vm1 = vcmp.lt.f32.partialorder %v701_v3, 1.0  ;;  %v704_v6 = vmul.f32 %v703_v63, %v700_v59  ;;  %v1026_v7 = vadd.f32 -0.5, %v701_v3 }
 0x39b   :  { %v476_v11 = vsel %vm475_vm13, %v474_v5, 0.0 }
 0x39c   :  { %477 = vadd.xlane.f32.xlu0 %v476_v11  ;;  %v706_v12 = vsel %vm702_vm1, %v704_v6, %v1026_v7 }
 0x39d   :  { %v707_v43 = vsel %vm699_vm15, %v706_v12, 0.0 }
 0x39e   :  { %v708_v14 = vsel %vm294_vm8, %v707_v43, 0.0 }
 0x3a0   :  { %709 = vadd.xlane.f32.xlu0 %v708_v14 }
 0x422   :  { %v491_v18 = vpop.xlane.xlu1 %490 }
 0x423   :  { %v492_v19 = vrot.slane %v491_v18, 4 }
 0x425   :  { %v493_v22 = vadd.f32 %v492_v19, %v491_v18 }
 0x426   :  { %v723_v23 = vpop.xlane.xlu1 %722 }
 0x427   :  { %v724_v24 = vrot.slane %v723_v23, 4  ;;  %v494_v27 = vrot.slane %v493_v22, 2 }
 0x429   :  { %v725_v28 = vadd.f32 %v724_v24, %v723_v23  ;;  %v478_v0 = vpop.xlane.xlu0 %477  ;;  %v495_v34 = vadd.f32 %v494_v27, %v493_v22 }
 0x42a   :  { %v479_v29 = vrot.slane %v478_v0, 4 }
 0x42b   :  { %v726_v32 = vrot.slane %v725_v28, 2  ;;  %v496_v39 = vrot.slane %v495_v34, 1 }
 0x42c   :  { %v480_v30 = vadd.f32 %v479_v29, %v478_v0 }
 0x42d   :  { %v710_v33 = vpop.xlane.xlu0 %709  ;;  %v727_v41 = vadd.f32 %v726_v32, %v725_v28  ;;  %v497_v48 = vadd.f32 %v496_v39, %v495_v34 }
 0x42e   :  { %v481_v35 = vrot.slane %v480_v30, 2  ;;  %v711_v36 = vrot.slane %v710_v33, 4 }
 0x42f   :  { %v728_v50 = vrot.slane %v727_v41, 1 }
 0x430   :  { %v712_v37 = vadd.f32 %v711_v36, %v710_v33  ;;  %v482_v38 = vadd.f32 %v481_v35, %v480_v30 }
 0x431   :  { %v729_v53 = vadd.f32 %v728_v50, %v727_v41 }
 0x432   :  { %v713_v42 = vrot.slane %v712_v37, 2  ;;  %v483_v44 = vrot.slane %v482_v38, 1 }
 0x434   :  { %v484_v45 = vadd.f32 %v483_v44, %v482_v38  ;;  %v714_v47 = vadd.f32 %v713_v42, %v712_v37 }
 0x436   :  { %1120 = vpush %v484_v45  ;;  %v715_v51 = vrot.slane %v714_v47, 1 }
 0x437   :  { %1122 = vpush %v497_v48 }
 0x438   :  { %1124 = vpush %v534_v46  ;;  %v716_v52 = vadd.f32 %v715_v51, %v714_v47 }
 0x439   :  { %1126 = vpush %v551_v49 }
 0x43a   :  { %1128 = vpush %v716_v52 }
 0x43b   :  { %1130 = vpush %v729_v53 }
 0x467   :  { %s1614_s28 = spop %1120 }
 0x468   :  { %s1616_s20 = spop %1122 }
 0x469   :  { %s1125_s21 = spop %1124 }
 0x46a   :  { %s536_s14 = sadd.f32 %s1125_s21, %s1113_s7  ;;  %s1127_s15 = spop %1126  ;;  %v798_v54 = vpop.f32.mrb[6].mxu0 }
 0x46b   :  { %s553_s3 = sadd.f32 %s1127_s15, %s1115_s29  ;;  %s1129_s16 = spop %1128  ;;  %1098 = vmatmul.mubr.msk.f32.vlgmr.msra.gmra.mrb[6].mxu1 %vm294_vm8, %v798_v54  ;;  %v1094_v9 = vpop.f32.mrb[7].mxu0 }
 0x46c   :  { %v910_v55 = vstv %s536_s14  ;;  %s718_s2 = sadd.f32 %s1129_s16, %s1117_s30  ;;  %s1131_s26 = spop %1130 }
 0x46d   :  { %911 = vst [vmem:[#allocation8] sm:$0xff] %v910_v55  ;;  %v912_v56 = vstv %s553_s3  ;;  %s731_s17 = sadd.f32 %s1131_s26, %s1119_s1 }
 0x46e   :  { %913 = vst [vmem:[#allocation9] sm:$0xff] %v912_v56  ;;  %v914_v10 = vstv %s718_s2 }
 0x46f   :  { %915 = vst [vmem:[#allocation11] sm:$0xff] %v914_v10  ;;  %v916_v57 = vstv %s731_s17 }
 0x470   :  { %917 = vst [vmem:[#allocation12] sm:$0xff] %v916_v57 }
 0x53e   :  { %v871_v59 = vpop.f32.mrb[6].mxu1 }
 0x53f   :  { %vm877_vm2 = vcmp.lt.f32.partialorder %v871_v59, 192.0  ;;  %v878_v60 = vsub.f32 %v876_v58, %v871_v59  ;;  %v1099_v61 = vpop.f32.mrb[7].mxu1 }
 0x540   :  { %v1031_v62 = vsel %vm877_vm2, 1.0, %v1371_v1 }
 0x541   :  { %v879_v63 = vand.u32 2147483647, %v878_v60  ;;  %v881_v2 = vmul.f32 0.5, %v878_v60  ;;  %v899_v3 = vsel %vm475_vm13, %v1031_v62, 0.0 }
 0x542   :  { %900 = vadd.xlane.f32.xlu1 %v899_v3 }
 0x543   :  { %v882_v4 = vmul.f32 %v881_v2, %v878_v60  ;;  %vm880_vm3 = vcmp.lt.f32.partialorder %v879_v63, 1.0  ;;  %v1030_v5 = vadd.f32 -0.5, %v879_v63 }
 0x545   :  { %v884_v6 = vsel %vm880_vm3, %v882_v4, %v1030_v5 }
 0x546   :  { %v885_v7 = vsel %vm877_vm2, %v884_v6, 0.0 }
 0x547   :  { %v886_v11 = vsel %vm475_vm13, %v885_v7, 0.0 }
 0x548   :  { %887 = vadd.xlane.f32.xlu0 %v886_v11 }
 0x549   :  { %1229 = shalt.err (!%p1226_p0)
}
 0x54a   :  { %s1230_s0 = scalar_lea.hbm %s1712_s9, 128 }
 0x54b   :  { %p1231_p1 = scmp.ne.s32.totalorder %s1712_s9, %s1230_s0  ;;  %p1234_p2 = scmp.lt.u32.totalorder %s1230_s0, %s1712_s9 }
 0x54d   :  { %p1236_p3 = pnand %p1234_p2, %p1231_p1 }
 0x54f   :  { %1239 = shalt.err (!%p1236_p3)
}
 0x550   :  { %941 = dma.vmem_to_hbm [thread:$0]  %s939_s19, 128, %s1712_s9, [#allocation10]  }
 0x551   :  { %s1240_s1 = scalar_lea.vmem %s959_s5, 128  ;;  %p1245_p5 = scmp.lt.s32.totalorder %s959_s5, %s959_s5 }
 0x552   :  { %p1241_p4 = scmp.ne.s32.totalorder %s959_s5, %s1240_s1  ;;  %p1246_p6 = scmp.lt.s32.totalorder %s1240_s1, %s1240_s1 }
 0x554   :  { %p1247_p7 = por %p1246_p6, %p1245_p5 }
 0x556   :  { %p1248_p8 = pnand %p1247_p7, %p1241_p4 }
 0x558   :  { %1251 = shalt.err (!%p1248_p8)
}
 0x559   :  { %s1252_s15 = scalar_lea.hbm %s1714_s11, 128 }
 0x55a   :  { %p1253_p9 = scmp.ne.s32.totalorder %s1714_s11, %s1252_s15  ;;  %p1256_p10 = scmp.lt.u32.totalorder %s1252_s15, %s1714_s11 }
 0x55c   :  { %p1258_p11 = pnand %p1256_p10, %p1253_p9 }
 0x55e   :  { %1261 = shalt.err (!%p1258_p11)
}
 0x55f   :  { %961 = dma.vmem_to_hbm [thread:$0]  %s959_s5, 128, %s1714_s11, [#allocation13]  }
 0x560   :  { %s1374_s18 = smov [#allocation8]   ;;  %s1375_s22 = smov [#allocation11]  }
 0x561   :  { %s928_s19 = sshll.u32 %s1374_s18, 4  ;;  %s948_s23 = sshll.u32 %s1375_s22, 4  ;;  %s929_s19 = int_to_ptr.vmem [resolvable:$true] %s928_s19  ;;  %s949_s23 = int_to_ptr.vmem [resolvable:$true] %s948_s23 }
 0x562   :  { %s1262_s4 = scalar_lea.vmem %s929_s19, 128  ;;  %p1267_p13 = scmp.lt.s32.totalorder %s929_s19, %s929_s19 }
 0x563   :  { %p1263_p12 = scmp.ne.s32.totalorder %s929_s19, %s1262_s4  ;;  %p1268_p0 = scmp.lt.s32.totalorder %s1262_s4, %s1262_s4 }
 0x565   :  { %p1269_p1 = por %p1268_p0, %p1267_p13 }
 0x567   :  { %p1270_p2 = pnand %p1269_p1, %p1263_p12 }
 0x569   :  { %1273 = shalt.err (!%p1270_p2)
}
 0x56a   :  { %s1274_s25 = scalar_lea.hbm %s1711_s8, 128 }
 0x56b   :  { %p1275_p3 = scmp.ne.s32.totalorder %s1711_s8, %s1274_s25  ;;  %p1278_p4 = scmp.lt.u32.totalorder %s1274_s25, %s1711_s8 }
 0x56d   :  { %p1280_p5 = pnand %p1278_p4, %p1275_p3 }
 0x56f   :  { %1283 = shalt.err (!%p1280_p5)
}
 0x570   :  { %931 = dma.vmem_to_hbm [thread:$0]  %s929_s19, 128, %s1711_s8, [#allocation4]  }
 0x571   :  { %s1284_s30 = scalar_lea.vmem %s949_s23, 128  ;;  %p1289_p7 = scmp.lt.s32.totalorder %s949_s23, %s949_s23 }
 0x572   :  { %p1285_p6 = scmp.ne.s32.totalorder %s949_s23, %s1284_s30  ;;  %p1290_p8 = scmp.lt.s32.totalorder %s1284_s30, %s1284_s30 }
 0x574   :  { %p1291_p9 = por %p1290_p8, %p1289_p7 }
 0x576   :  { %p1292_p10 = pnand %p1291_p9, %p1285_p6 }
 0x578   :  { %1295 = shalt.err (!%p1292_p10)
}
 0x579   :  { %s1296_s14 = scalar_lea.hbm %s1713_s10, 128 }
 0x57a   :  { %p1297_p11 = scmp.ne.s32.totalorder %s1713_s10, %s1296_s14  ;;  %p1300_p12 = scmp.lt.u32.totalorder %s1296_s14, %s1713_s10 }
 0x57c   :  { %p1302_p13 = pnand %p1300_p12, %p1297_p11 }
 0x57e   :  { %1305 = shalt.err (!%p1302_p13)
}
 0x57f   :  { %951 = dma.vmem_to_hbm [thread:$0]  %s949_s23, 128, %s1713_s10, [#allocation10]  }
 0x580   :  { %s1376_s9 = smov [#allocation14]   ;;  %s1377_s18 = smov [#allocation15]  }
 0x581   :  { %s968_s10 = sshll.u32 %s1376_s9, 4  ;;  %s978_s19 = sshll.u32 %s1377_s18, 4  ;;  %s969_s10 = int_to_ptr.vmem [resolvable:$true] %s968_s10  ;;  %s1672_s19 = int_to_ptr.vmem [resolvable:$true] %s978_s19 }
 0x582   :  { %s1306_s24 = scalar_lea.vmem %s969_s10, 128  ;;  %p1311_p1 = scmp.lt.s32.totalorder %s969_s10, %s969_s10 }
 0x583   :  { %p1307_p0 = scmp.ne.s32.totalorder %s969_s10, %s1306_s24  ;;  %p1312_p2 = scmp.lt.s32.totalorder %s1306_s24, %s1306_s24 }
 0x585   :  { %p1313_p3 = por %p1312_p2, %p1311_p1 }
 0x587   :  { %p1314_p4 = pnand %p1313_p3, %p1307_p0 }
 0x5cf   :  { %v901_v1 = vpop.xlane.xlu1 %900 }
 0x5d0   :  { %v902_v12 = vrot.slane %v901_v1, 4 }
 0x5d2   :  { %v903_v43 = vadd.f32 %v902_v12, %v901_v1 }
 0x5d4   :  { %v904_v14 = vrot.slane %v903_v43, 2 }
 0x5d5   :  { %v888_v15 = vpop.xlane.xlu0 %887 }
 0x5d6   :  { %v889_v16 = vrot.slane %v888_v15, 4  ;;  %v905_v18 = vadd.f32 %v904_v14, %v903_v43 }
 0x5d8   :  { %v890_v17 = vadd.f32 %v889_v16, %v888_v15  ;;  %v906_v21 = vrot.slane %v905_v18, 1 }
 0x5da   :  { %v891_v19 = vrot.slane %v890_v17, 2  ;;  %v907_v24 = vadd.f32 %v906_v21, %v905_v18 }
 0x5dc   :  { %v892_v20 = vadd.f32 %v891_v19, %v890_v17 }
 0x5de   :  { %v893_v22 = vrot.slane %v892_v20, 1 }
 0x5e0   :  { %v894_v23 = vadd.f32 %v893_v22, %v892_v20 }
 0x5e2   :  { %1132 = vpush %v894_v23 }
 0x5e3   :  { %1134 = vpush %v907_v24 }
 0x613   :  { %s1133_s17 = spop %1132 }
 0x614   :  { %s896_s22 = sadd.f32 %s1133_s17, %s1614_s28  ;;  %s1135_s23 = spop %1134 }
 0x615   :  { %s909_s4 = sadd.f32 %s1135_s23, %s1616_s20 }
 0x616   :  { %v918_v25 = vstv %s896_s22 }
 0x617   :  { %919 = vst [vmem:[#allocation14] sm:$0xff] %v918_v25  ;;  %v920_v26 = vstv %s909_s4 }
 0x618   :  { %921 = vst [vmem:[#allocation15] sm:$0xff] %v920_v26 }
 0x619   :  { %1317 = shalt.err (!%p1314_p4)
}
 0x61a   :  { %s1318_s28 = scalar_lea.hbm %s1715_s12, 128 }
 0x61b   :  { %p1319_p5 = scmp.ne.s32.totalorder %s1715_s12, %s1318_s28  ;;  %p1322_p6 = scmp.lt.u32.totalorder %s1318_s28, %s1715_s12 }
 0x61d   :  { %p1324_p7 = pnand %p1322_p6, %p1319_p5 }
 0x61f   :  { %1327 = shalt.err (!%p1324_p7)
}
 0x620   :  { %971 = dma.vmem_to_hbm [thread:$0]  %s969_s10, 128, %s1715_s12, [#allocation13]  }
 0x621   :  { %s1328_s29 = scalar_lea.vmem %s1672_s19, 128  ;;  %p1333_p9 = scmp.lt.s32.totalorder %s1672_s19, %s1672_s19 }
 0x622   :  { %p1329_p8 = scmp.ne.s32.totalorder %s1672_s19, %s1328_s29  ;;  %p1334_p10 = scmp.lt.s32.totalorder %s1328_s29, %s1328_s29 }
 0x624   :  { %p1335_p11 = por %p1334_p10, %p1333_p9 }
 0x626   :  { %p1336_p12 = pnand %p1335_p11, %p1329_p8 }
 0x628   :  { %1339 = shalt.err (!%p1336_p12)
}
 0x629   :  { %s1340_s21 = scalar_lea.hbm %s1716_s13, 128 }
 0x62a   :  { %p1341_p13 = scmp.ne.s32.totalorder %s1716_s13, %s1340_s21  ;;  %p1344_p0 = scmp.lt.u32.totalorder %s1340_s21, %s1716_s13 }
 0x62c   :  { %p1346_p1 = pnand %p1344_p0, %p1341_p13 }
 0x62e   :  { %1349 = shalt.err (!%p1346_p1)
}
 0x62f   :  { %981 = dma.vmem_to_hbm [thread:$0]  %s1672_s19, 128, %s1716_s13, [#allocation16]  }
 0x630   :  { %1354 = dma.done.wait [#allocation4], 128  }
 0x631   :  { %1355 = vsyncadd [#allocation4], 4294967168 }
 0x632   :  { %1356 = dma.done.wait [#allocation10], 256  }
 0x633   :  { %1357 = vsyncadd [#allocation10], 4294967040 }
 0x634   :  { %1358 = dma.done.wait [#allocation13], 256  }
 0x635   :  { %1359 = vsyncadd [#allocation13], 4294967040 }
 0x636   :  { %1360 = dma.done.wait [#allocation16], 128  }
 0x637   :  { %1361 = vsyncadd [#allocation16], 4294967168 }
 0x638   :  { %1000 = vsyncpa [#allocation3], 1 }
 0x639   :  { %1001 = vsyncpa [#allocation6], 1 }
 0x63a   :  { %1002 = vsyncpa [#allocation4], 1 }
 0x63b   :  { %1003 = vsyncpa [#allocation10], 1 }
 0x63c   :  { %1004 = vsyncpa [#allocation13], 1 }
 0x63d   :  { %1005 = vsyncpa [#allocation16], 1 }

</bundles_post_ra>
